<compile_context>
chip_gen: v7x
topology: tpu7x:2x2x1
jax: 0.10.0
libtpu: 0.0.40
codegen_flags: <defaults>
</compile_context>

<pallas_src>
import functools

import jax
import jax.numpy as jnp
from jax.experimental import pallas as pl
from jax.experimental.pallas import tpu as pltpu


def _round_up(x: int, m: int) -> int:
    return ((x + m - 1) // m) * m


def _conv_gemm_kernel(patches_ref, w_ref, b_ref, o_ref, *, activation, valid_o):
    # MXU: bf16 x bf16 -> f32 accumulate.
    acc = jnp.dot(patches_ref[...], w_ref[...], preferred_element_type=jnp.float32)
    acc = acc + b_ref[...]  # (TM, O_pad) + (1, O_pad), f32

    if activation == "identity":
        out = acc
    elif activation == "relu":
        out = jnp.maximum(acc, 0.0)
    elif activation == "tanh":
        out = jnp.tanh(acc)
    elif activation == "softmax":
        # F.softmax over channel dim (dim=1 of NCHW == last GEMM axis here).
        # Padded channels must not contribute to the denominator -> mask to -inf.
        col = jax.lax.broadcasted_iota(jnp.int32, acc.shape, 1)
        logits = jnp.where(col < valid_o, acc, -jnp.inf)
        mx = jnp.max(logits, axis=-1, keepdims=True)
        e = jnp.exp(logits - mx)
        out = e * pl.reciprocal(jnp.sum(e, axis=-1, keepdims=True), approx=True)
    else:
        raise ValueError(f"unregistered activation {activation}")

    o_ref[...] = out.astype(o_ref.dtype)


def conv2d_layer(x, w, b, *, stride, activation="relu", tm=512):
    """Pallas equivalent of Conv2DLayer.forward. x: NCHW, w: OIHW (PyTorch), b: (O,)."""
    n, c, h, wdt = x.shape
    o, c_w, kh, kw = w.shape
    assert c == c_w
    oh = (h - kh) // stride + 1
    ow = (wdt - kw) // stride + 1
    m = n * oh * ow
    k = c * kh * kw

    # --- glue: im2col in plain JAX (outside the kernel) ---
    # TODO(synk): eliminate the KH*KW im2col HBM read amplification by doing the
    # (kh, kw) shift-reduction inside the kernel on halo'd NHWC input tiles.
    cols = []
    for i in range(kh):
        row = []
        for j in range(kw):
            row.append(
                jax.lax.slice(
                    x,
                    (0, 0, i, j),
                    (n, c, i + stride * (oh - 1) + 1, j + stride * (ow - 1) + 1),
                    (1, 1, stride, stride),
                )  # (N, C, OH, OW)
            )
        cols.append(jnp.stack(row, axis=-1))              # (N, C, OH, OW, KW)
    patches = jnp.stack(cols, axis=-2)                    # (N, C, OH, OW, KH, KW)
    patches = jnp.transpose(patches, (0, 2, 3, 1, 4, 5)).reshape(m, k)

    # --- pad to TPU-friendly shapes ---
    o_pad = _round_up(o, 128)     # lane-dense output: full-width stores, full MXU N
    k_pad = _round_up(k, 16)      # aligned bf16 sublane packing on the contraction dim
    if m <= tm:                   # small problem: one tile covering all (padded) rows
        tm = _round_up(m, 16)
        m_pad = tm
    else:
        m_pad = _round_up(m, tm)

    patches = jnp.pad(patches, ((0, m_pad - m), (0, k_pad - k))).astype(jnp.bfloat16)
    w_mat = jnp.transpose(w.reshape(o, k))                                  # (K, O)
    w_mat = jnp.pad(w_mat, ((0, k_pad - k), (0, o_pad - o))).astype(jnp.bfloat16)
    b_mat = jnp.pad(b.reshape(1, o).astype(jnp.float32), ((0, 0), (0, o_pad - o)))

    kernel = functools.partial(_conv_gemm_kernel, activation=activation, valid_o=o)

    grid = (m_pad // tm,)
    cost = pl.CostEstimate(
        flops=2 * m_pad * k_pad * o_pad,
        transcendentals=m_pad * o_pad if activation in ("tanh", "softmax") else 0,
        bytes_accessed=(m_pad * k_pad + k_pad * o_pad) * 2 + (m_pad + 1) * o_pad * 4,
    )

    out = pl.pallas_call(
        kernel,
        out_shape=jax.ShapeDtypeStruct((m_pad, o_pad), jnp.float32),
        grid_spec=pltpu.PrefetchScalarGridSpec(
            num_scalar_prefetch=0,
            grid=grid,
            in_specs=[
                pl.BlockSpec((tm, k_pad), lambda i: (i, 0)),     # pipelined over M tiles
                pl.BlockSpec((k_pad, o_pad), lambda i: (0, 0)),  # tiny weight, VMEM-resident
                pl.BlockSpec((1, o_pad), lambda i: (0, 0)),      # bias, VMEM-resident
            ],
            out_specs=pl.BlockSpec((tm, o_pad), lambda i: (i, 0)),
        ),
        compiler_params=pltpu.CompilerParams(
            dimension_semantics=("parallel",),        # megacore-sharded on v7x; harmless elsewhere
            vmem_limit_bytes=32 * 1024 * 1024,        # explicit budget, safe on v7x's 64 MiB VMEM
        ),
        cost_estimate=cost,
    )(patches, w_mat, b_mat)

    out = out[:m, :o].reshape(n, oh, ow, o)           # drop padded rows/channels
    return jnp.transpose(out, (0, 3, 1, 2))           # back to NCHW


if __name__ == "__main__":
    # Conv2DLayer(input_size=4, output_size=8, kernel_size=3, stride=2, activation_fn="relu")
    key = jax.random.PRNGKey(0)
    kx, kw_key, kb_key = jax.random.split(key, 3)

    N, C, H, W = 2, 4, 16, 16
    O, K, S = 8, 3, 2

    x = jax.random.normal(kx, (N, C, H, W), dtype=jnp.float32)
    fan_in = C * K * K
    bound = 1.0 / (fan_in ** 0.5)
    w = jax.random.uniform(kw_key, (O, C, K, K), jnp.float32, -bound, bound)
    b = jax.random.uniform(kb_key, (O,), jnp.float32, -bound, bound)

    y = conv2d_layer(x, w, b, stride=S, activation="relu")
    y = jax.block_until_ready(y)

    # Reference uses the same bf16 rounding of inputs/weights the kernel feeds the MXU,
    # with f32 accumulation (matches MXU accumulate), so comparison is tight.
    xb = x.astype(jnp.bfloat16).astype(jnp.float32)
    wb = w.astype(jnp.bfloat16).astype(jnp.float32)
    ref = jax.lax.conv_general_dilated(
        xb, wb, window_strides=(S, S), padding="VALID",
        dimension_numbers=("NCHW", "OIHW", "NCHW"),
        precision=jax.lax.Precision.HIGHEST,
    ) + b.reshape(1, O, 1, 1)
    ref = jnp.maximum(ref, 0.0)

    OH = (H - K) // S + 1
    OW = (W - K) // S + 1
    assert y.shape == (N, O, OH, OW)
    assert jnp.allclose(y, ref, atol=1e-4, rtol=1e-4), float(jnp.max(jnp.abs(y - ref)))

    # Exercise the softmax path (channel-dim softmax, like F.softmax dim=1):
    # padded channels must not pollute the denominator -> rows sum to 1.
    ys = conv2d_layer(x, w, b, stride=S, activation="softmax")
    ys = jax.block_until_ready(ys)
    sums = jnp.sum(ys, axis=1)
    assert jnp.allclose(sums, jnp.ones_like(sums), atol=5e-3)

    print("KERNEL_OK")
</pallas_src>

<mosaic_0001>
module attributes {stable_mosaic.version = 11 : i64} {
  func.func @_conv_gemm_kernel(%arg0: i32, %arg1: memref<112x48xbf16, #tpu.memory_space<vmem>>, %arg2: memref<48x128xbf16, #tpu.memory_space<vmem>>, %arg3: memref<1x128xf32, #tpu.memory_space<vmem>>, %arg4: memref<112x128xf32, #tpu.memory_space<vmem>>) attributes {dimension_semantics = [#tpu.dimension_semantics<parallel>], iteration_bounds = array<i64: 1>, scalar_prefetch = 0 : i64, scratch_operands = 0 : i64, tpu.core_type = #tpu.core_type<tc>, window_params = [{transform_indices = @transform_0, window_bounds = array<i64: 112, 48>}, {pipeline_mode = #tpu.pipeline_mode<synchronous>, transform_indices = @transform_1, window_bounds = array<i64: 48, 128>}, {pipeline_mode = #tpu.pipeline_mode<synchronous>, transform_indices = @transform_2, window_bounds = array<i64: 1, 128>}, {transform_indices = @transform_3, window_bounds = array<i64: 112, 128>}]} {
    %c0 = arith.constant 0 : index
    %c0_0 = arith.constant 0 : index
    %0 = vector.load %arg1[%c0, %c0_0] : memref<112x48xbf16, #tpu.memory_space<vmem>>, vector<112x48xbf16>
    %c0_1 = arith.constant 0 : index
    %c0_2 = arith.constant 0 : index
    %1 = vector.load %arg2[%c0_1, %c0_2] : memref<48x128xbf16, #tpu.memory_space<vmem>>, vector<48x128xbf16>
    %cst = arith.constant dense<0.000000e+00> : vector<112x128xf32>
    %2 = tpu.matmul %0, %1, %cst {dimension_numbers = #tpu.dot_dimension_numbers<[1], [0], [0], [1], [0, 0, 1, 1], [], []>} : vector<112x48xbf16>, vector<48x128xbf16>, vector<112x128xf32> -> vector<112x128xf32>
    %c0_3 = arith.constant 0 : index
    %c0_4 = arith.constant 0 : index
    %3 = vector.load %arg3[%c0_3, %c0_4] : memref<1x128xf32, #tpu.memory_space<vmem>>, vector<1x128xf32>
    %4 = vector.broadcast %3 : vector<1x128xf32> to vector<112x128xf32>
    %5 = arith.addf %2, %4 : vector<112x128xf32>
    %cst_5 = arith.constant 0.000000e+00 : f32
    %6 = vector.broadcast %cst_5 : f32 to vector<112x128xf32>
    %7 = arith.maximumf %5, %6 : vector<112x128xf32>
    %c0_6 = arith.constant 0 : index
    %c0_7 = arith.constant 0 : index
    %8 = vector.load %arg4[%c0_6, %c0_7] : memref<112x128xf32, #tpu.memory_space<vmem>>, vector<112x128xf32>
    tpu.vector_store %arg4[%c0_6, %c0_7], %7 {strides = array<i32>} : memref<112x128xf32, #tpu.memory_space<vmem>>, vector<112x128xf32>,
    return
  }
  func.func @transform_0(%arg0: i32) -> (i32, i32) {
    %c0_i32 = arith.constant 0 : i32
    %c0_i32_0 = arith.constant 0 : i32
    return %arg0, %c0_i32 : i32, i32
  }
  func.func @transform_1(%arg0: i32) -> (i32, i32) {
    %c0_i32 = arith.constant 0 : i32
    %c0_i32_0 = arith.constant 0 : i32
    %c0_i32_1 = arith.constant 0 : i32
    return %c0_i32, %c0_i32_0 : i32, i32
  }
  func.func @transform_2(%arg0: i32) -> (i32, i32) {
    %c0_i32 = arith.constant 0 : i32
    %c0_i32_0 = arith.constant 0 : i32
    %c0_i32_1 = arith.constant 0 : i32
    return %c0_i32, %c0_i32_0 : i32, i32
  }
  func.func @transform_3(%arg0: i32) -> (i32, i32) {
    %c0_i32 = arith.constant 0 : i32
    %c0_i32_0 = arith.constant 0 : i32
    return %arg0, %c0_i32 : i32, i32
  }
}

</mosaic_0001>

<bundles_post_ra>
// kernel: tpu_custom_call.1
= control target key start
LH: loop header
LB: loop body
LE: loop exit
PB: predicated region body
PF: predicated region fallthrough
CT: control target
= control target key end

     0   :  { %v358_v1 = vmov 0.0   ;;  %vm359_vm0 = vmmov 0   ;;  %vm96_vm1 = vcmask 392192   ;;  %s458_s0 = inlined_call_operand.vmem [shape: bf16[112,48], index: 0, kind: input, shape index: {}]   ;;  %s459_s1 = inlined_call_operand.vmem [shape: bf16[48,128], index: 1, kind: input, shape index: {}]   ;;  %s460_s2 = inlined_call_operand.vmem [shape: f32[1,128], index: 2, kind: input, shape index: {}]   ;;  %s461_s3 = inlined_call_operand.hbm [shape: f32[112,128], index: 3, kind: output, shape index: {}]  }
   0x1   :  { %v324_v0 = vld [vmem:[%s459_s1] sm:$0xff]   ;;  %279 = vmatprep.subr.bf16.mxu0 %v358_v1  ;;  %313 = vmatprep.subr.bf16.mxu1 %v358_v1  ;;  %v325_v2 = vld [vmem:[%s459_s1 + $0x8] sm:$0xff]   ;;  %v326_v3 = vld [vmem:[%s459_s1 + $0x10] sm:$0xff]  }
   0x2   :  { %280 = vmatpush3.bf16.msra.mxu0 %v324_v0  ;;  %316 = vmatpush3.bf16.msra.mxu1 %v324_v0  ;;  %v327_v4 = vld [vmem:[%s458_s0] sm:$0xff]  }
   0x3   :  { %281 = vmatprep.subr.bf16.mxu0 %v358_v1  ;;  %314 = vmatprep.subr.bf16.mxu1 %v358_v1  ;;  %v328_v5 = vld [vmem:[%s458_s0 + $0x20] sm:$0xff]  }
   0x4   :  { %285 = vmatprep.mubr.msk.bf16.mxu0 %vm359_vm0, %v358_v1  ;;  %301 = vmatprep.mubr.msk.bf16.mxu1 %vm359_vm0, %v358_v1 }
   0x6   :  { %282 = vmatpush3.bf16.msra.mxu0 %v325_v2  ;;  %317 = vmatpush3.bf16.msra.mxu1 %v325_v2 }
   0x7   :  { %283 = vmatprep.subr.bf16.mxu0 %v358_v1  ;;  %315 = vmatprep.subr.bf16.mxu1 %v358_v1 }
   0xa   :  { %284 = vmatpush3.bf16.msra.mxu0 %v326_v3  ;;  %318 = vmatpush3.bf16.msra.mxu1 %v326_v3 }
   0xb   :  { %8 = vsyncpa [#allocation3], 0  ;;  %v329_v6 = vld [vmem:[%s458_s0 + $0x8] sm:$0xff]   ;;  %v331_v8 = vld [vmem:[%s458_s0 + $0x10] sm:$0xff]  }
   0xc   :  { %v330_v7 = vld [vmem:[%s458_s0 + $0x28] sm:$0xff]   ;;  %v332_v9 = vld [vmem:[%s458_s0 + $0x30] sm:$0xff]   ;;  %v333_v10 = vld [vmem:[%s458_s0 + $0x18] sm:$0xff]   ;;  %s360_s0 = smov [#allocation2]  }
   0xd   :  { %286 = vmatmul.mubr.msk.bf16.vlgmr.msra.gmra.mrb[0].mxu0 %vm96_vm1, %v327_v4  ;;  %302 = vmatmul.mubr.msk.bf16.vlgmr.msra.gmra.mrb[0].mxu1 %vm96_vm1, %v328_v5  ;;  %v430_v11 = vld [vmem:[%s460_s2] ss:$0 sm:$0xff]  ;;  %s240_s2 = sshll.u32 %s360_s0, 4  ;;  %s241_s2 = int_to_ptr.vmem [resolvable:$true] %s240_s2 }
   0xe   :  { %289 = vmatprep.mubr.msk.bf16.mxu0 %vm359_vm0, %v358_v1  ;;  %305 = vmatprep.mubr.msk.bf16.mxu1 %vm359_vm0, %v358_v1  ;;  %s334_s6 = scalar_lea.vmem %s241_s2, 1792  ;;  %p339_p1 = scmp.lt.s32.totalorder %s241_s2, %s241_s2 }
   0xf   :  { %p335_p0 = scmp.ne.s32.totalorder %s241_s2, %s334_s6  ;;  %p340_p2 = scmp.lt.s32.totalorder %s334_s6, %s334_s6 }
  0x11   :  { %p341_p3 = por %p340_p2, %p339_p1 }
  0x13   :  { %p342_p4 = pnand %p341_p3, %p335_p0 }
  0x15   :  { %290 = vmatmul.mubr.msk.bf16.gmra.mrb[4].mxu0 %vm96_vm1, %v329_v6  ;;  %306 = vmatmul.mubr.msk.bf16.gmra.mrb[4].mxu1 %vm96_vm1, %v330_v7 }
  0x16   :  { %293 = vmatprep.mubr.msk.bf16.mxu0 %vm359_vm0, %v358_v1  ;;  %309 = vmatprep.mubr.msk.bf16.mxu1 %vm359_vm0, %v358_v1 }
  0x1d   :  { %294 = vmatmul.mubr.msk.bf16.gmra.mrb[8].mxu0 %vm96_vm1, %v331_v8  ;;  %310 = vmatmul.mubr.msk.bf16.gmra.mrb[8].mxu1 %vm96_vm1, %v332_v9 }
  0x1e   :  { %297 = vmatprep.mubr.msk.bf16.mxu0 %vm359_vm0, %v358_v1 }
  0x25   :  { %298 = vmatmul.mubr.msk.bf16.gmra.mrb[12].mxu0 %vm96_vm1, %v333_v10 }
  0xe0   :  { %v152_v12 = vpop.f32.mrb[0].mxu0  ;;  %v184_v13 = vpop.f32.mrb[0].mxu1 }
  0xe1   :  { %v153_v14 = vadd.f32 %v430_v11, %v152_v12  ;;  %v287_v15 = vpop.f32.mrb[1].mxu0  ;;  %v185_v16 = vadd.f32 %v430_v11, %v184_v13  ;;  %v303_v17 = vpop.f32.mrb[1].mxu1 }
  0xe2   :  { %v155_v18 = vpop.f32.mrb[2].mxu0  ;;  %v187_v19 = vpop.f32.mrb[2].mxu1 }
  0xe3   :  { %v207_v20 = vmax.f32 %v153_v14, 0.0  ;;  %v156_v21 = vadd.f32 %v430_v11, %v155_v18  ;;  %v288_v22 = vpop.f32.mrb[3].mxu0  ;;  %v215_v23 = vmax.f32 %v185_v16, 0.0  ;;  %v188_v24 = vadd.f32 %v430_v11, %v187_v19  ;;  %v304_v25 = vpop.f32.mrb[3].mxu1 }
  0xe5   :  { %221 = vst [vmem:[#allocation2] sm:$0xff] %v207_v20  ;;  %v208_v26 = vmax.f32 %v156_v21, 0.0  ;;  %229 = vst [vmem:[#allocation2 + $0x40] sm:$0xff] %v215_v23  ;;  %v216_v27 = vmax.f32 %v188_v24, 0.0 }
  0xe7   :  { %222 = vst [vmem:[#allocation2 + $0x8] sm:$0xff] %v208_v26  ;;  %230 = vst [vmem:[#allocation2 + $0x48] sm:$0xff] %v216_v27 }
  0xe8   :  { %v160_v28 = vpop.f32.mrb[4].mxu0  ;;  %v192_v29 = vpop.f32.mrb[4].mxu1 }
  0xe9   :  { %v161_v30 = vadd.f32 %v430_v11, %v160_v28  ;;  %v291_v31 = vpop.f32.mrb[5].mxu0  ;;  %v193_v32 = vadd.f32 %v430_v11, %v192_v29  ;;  %v307_v33 = vpop.f32.mrb[5].mxu1 }
  0xea   :  { %v163_v34 = vpop.f32.mrb[6].mxu0  ;;  %v195_v35 = vpop.f32.mrb[6].mxu1 }
  0xeb   :  { %v209_v36 = vmax.f32 %v161_v30, 0.0  ;;  %v164_v37 = vadd.f32 %v430_v11, %v163_v34  ;;  %v292_v38 = vpop.f32.mrb[7].mxu0  ;;  %v217_v39 = vmax.f32 %v193_v32, 0.0  ;;  %v196_v40 = vadd.f32 %v430_v11, %v195_v35  ;;  %v308_v41 = vpop.f32.mrb[7].mxu1 }
  0xed   :  { %223 = vst [vmem:[#allocation2 + $0x10] sm:$0xff] %v209_v36  ;;  %v210_v42 = vmax.f32 %v164_v37, 0.0  ;;  %231 = vst [vmem:[#allocation2 + $0x50] sm:$0xff] %v217_v39  ;;  %v218_v43 = vmax.f32 %v196_v40, 0.0 }
  0xef   :  { %224 = vst [vmem:[#allocation2 + $0x18] sm:$0xff] %v210_v42  ;;  %232 = vst [vmem:[#allocation2 + $0x58] sm:$0xff] %v218_v43 }
  0xf0   :  { %v168_v44 = vpop.f32.mrb[8].mxu0  ;;  %v200_v45 = vpop.f32.mrb[8].mxu1 }
  0xf1   :  { %v169_v46 = vadd.f32 %v430_v11, %v168_v44  ;;  %v295_v47 = vpop.f32.mrb[9].mxu0  ;;  %v201_v48 = vadd.f32 %v430_v11, %v200_v45  ;;  %v311_v49 = vpop.f32.mrb[9].mxu1 }
  0xf2   :  { %v171_v50 = vpop.f32.mrb[10].mxu0  ;;  %v203_v51 = vpop.f32.mrb[10].mxu1 }
  0xf3   :  { %v211_v52 = vmax.f32 %v169_v46, 0.0  ;;  %v172_v53 = vadd.f32 %v430_v11, %v171_v50  ;;  %v296_v54 = vpop.f32.mrb[11].mxu0  ;;  %v219_v55 = vmax.f32 %v201_v48, 0.0  ;;  %v204_v56 = vadd.f32 %v430_v11, %v203_v51  ;;  %v312_v57 = vpop.f32.mrb[11].mxu1 }
  0xf5   :  { %225 = vst [vmem:[#allocation2 + $0x20] sm:$0xff] %v211_v52  ;;  %v212_v58 = vmax.f32 %v172_v53, 0.0  ;;  %233 = vst [vmem:[#allocation2 + $0x60] sm:$0xff] %v219_v55  ;;  %v220_v59 = vmax.f32 %v204_v56, 0.0 }
  0xf7   :  { %226 = vst [vmem:[#allocation2 + $0x28] sm:$0xff] %v212_v58  ;;  %234 = vst [vmem:[#allocation2 + $0x68] sm:$0xff] %v220_v59 }
  0xf8   :  { %v176_v60 = vpop.f32.mrb[12].mxu0 }
  0xf9   :  { %v177_v61 = vadd.f32 %v430_v11, %v176_v60  ;;  %v299_v62 = vpop.f32.mrb[13].mxu0 }
  0xfa   :  { %v179_v63 = vpop.f32.mrb[14].mxu0 }
  0xfb   :  { %v213_v0 = vmax.f32 %v177_v61, 0.0  ;;  %v180_v1 = vadd.f32 %v430_v11, %v179_v63  ;;  %v300_v2 = vpop.f32.mrb[15].mxu0 }
  0xfd   :  { %227 = vst [vmem:[#allocation2 + $0x30] sm:$0xff] %v213_v0  ;;  %v214_v3 = vmax.f32 %v180_v1, 0.0 }
  0xff   :  { %228 = vst [vmem:[#allocation2 + $0x38] sm:$0xff] %v214_v3 }
 0x100   :  { %345 = shalt.err (!%p342_p4)
}
 0x101   :  { %s346_s9 = scalar_lea.hbm %s461_s3, 1792 }
 0x102   :  { %p347_p5 = scmp.ne.s32.totalorder %s461_s3, %s346_s9  ;;  %p350_p6 = scmp.lt.u32.totalorder %s346_s9, %s461_s3 }
 0x104   :  { %p352_p7 = pnand %p350_p6, %p347_p5 }
 0x106   :  { %355 = shalt.err (!%p352_p7)
}
 0x107   :  { %s361_s14 = smov 128   ;;  %s362_s15 = smov 8  }
 0x108   :  { %246 = dma.vmem_to_hbm [thread:$0]  %s241_s2, 1792, %s461_s3, [#allocation3], %s361_s14, %s361_s14, %s362_s15  }
 0x109   :  { %356 = dma.done.wait [#allocation3], 1792  }
 0x10a   :  { %357 = vsyncadd [#allocation3], 4294965504 }
 0x10b   :  { %250 = vsyncpa [#allocation3], 1 }

</bundles_post_ra>
